<compile_context>
chip_gen: v5e
topology: v5e:2x2
jax: 0.10.0
libtpu: 0.0.40
codegen_flags: <defaults>
</compile_context>

<pallas_src>
import jax
import jax.numpy as jnp
from jax import lax
from jax.experimental import pallas as pl
from jax.experimental.pallas import tpu as pltpu


_NSEM = 32  # in-flight row DMAs for the HBM-gather fallback path (power of 2)


def _round_up(x, m):
    return (x + m - 1) // m * m


def _vmem_capacity_bytes():
    """Physical VMEM capacity; conservative (v7x-sized) fallback if unknown."""
    try:
        info = pltpu.get_tpu_info()
        cap = getattr(info, "vmem_capacity_bytes", None)
        if cap:
            return int(cap)
    except Exception:
        pass
    return 64 * 1024 * 1024


# ---------------------------------------------------------------------------
# Path "onehot": tiny vocab -> one-hot matmul on the MXU (exact for 16-bit).
# ---------------------------------------------------------------------------
def _embed_onehot_kernel(ids_ref, table_ref, out_ref):
    # ids_ref:   VMEM (tok_block, 1) int32
    # table_ref: VMEM (V, D)   (constant block index -> DMA'd from HBM once)
    # out_ref:   VMEM (tok_block, D)
    V = table_ref.shape[0]
    ids = ids_ref[...]                                          # (tok_block, 1)
    vocab = lax.broadcasted_iota(jnp.int32, (ids.shape[0], V), 1)
    onehot = (ids == vocab).astype(table_ref.dtype)             # exact 0/1
    out_ref[...] = jnp.dot(
        onehot, table_ref[...], preferred_element_type=jnp.float32
    ).astype(out_ref.dtype)


# ---------------------------------------------------------------------------
# Path "vmem": embedding table resident in VMEM; dense 8-row grouped stores.
# ---------------------------------------------------------------------------
def _embed_vmem_kernel(ids_ref, table_ref, out_ref):
    # ids_ref:   SMEM (T_pad,) int32   (scalar prefetch)
    # table_ref: VMEM (V, D)           (whole table; loaded from HBM once)
    # out_ref:   VMEM (tok_block, D)   (dense output slab for this grid step)
    tok_block, D = out_ref.shape
    base = pl.program_id(0) * tok_block
    n_groups = tok_block // 8
    # Chunk D to bound vreg pressure regardless of embedding width.
    d_chunk = min(D, 256)

    def group(g, carry):
        r0 = pl.multiple_of(g * 8, 8)          # sublane-aligned store start
        row_base = base + r0
        rows_idx = [ids_ref[row_base + j] for j in range(8)]
        for c0 in range(0, D, d_chunk):
            cw = min(d_chunk, D - c0)
            rows = [table_ref[pl.ds(rows_idx[j], 1), c0:c0 + cw]
                    for j in range(8)]
            # Pack 8 single-sublane rows (XLU work) -> one dense (8, cw) store.
            out_ref[pl.ds(r0, 8), c0:c0 + cw] = jnp.concatenate(rows, axis=0)
        return carry

    lax.fori_loop(0, n_groups, group, 0, unroll=2)


# ---------------------------------------------------------------------------
# Path "hbm": table stays in HBM; per-row DMAs land directly in the output.
# ---------------------------------------------------------------------------
def _embed_hbm_kernel(ids_ref, table_hbm, out_ref, sems):
    # ids_ref:   SMEM (T_pad,) int32   (scalar prefetch)
    # table_hbm: HBM  (V, D)           (raw ref, no auto-DMA)
    # out_ref:   VMEM (tok_block, D)   (DMA destination; no staging buffer)
    # sems:      DMA semaphore pool (_NSEM,)
    tok_block = out_ref.shape[0]
    base = pl.program_id(0) * tok_block

    def desc(j):
        row = ids_ref[base + j]
        return pltpu.make_async_copy(
            table_hbm.at[row], out_ref.at[j], sems.at[j & (_NSEM - 1)]
        )

    def start(j):
        desc(j).start()

    def wait(j):
        desc(j).wait()   # true descriptor (same row), not a placeholder

    # Prime up to _NSEM row DMAs.
    @pl.loop(0, min(_NSEM, tok_block))
    def _(j):
        start(j)

    # Steady state: retire the oldest slot, immediately reuse it.
    if tok_block > _NSEM:
        @pl.loop(_NSEM, tok_block)
        def _(j):
            wait(j - _NSEM)
            start(j)

    # Drain the tail.
    @pl.loop(max(tok_block - _NSEM, 0), tok_block)
    def _(j):
        wait(j)


# ---------------------------------------------------------------------------
# Wrapper
# ---------------------------------------------------------------------------
def embedder_forward(x_ids, embed_table, *, tok_block=None, path=None):
    """Pallas equivalent of Embedder.forward: embed_table[x_ids].

    x_ids:       integer token ids, any shape (e.g. (B, S))
    embed_table: (V, D) embedding table
    returns:     x_ids.shape + (D,) with embed_table's dtype
    path:        None (auto) | "onehot" | "vmem" | "hbm"
    """
    lead_shape = x_ids.shape
    V, D = embed_table.shape
    T = 1
    for s in lead_shape:
        T *= int(s)
    itemsize = jnp.dtype(embed_table.dtype).itemsize
    table_bytes = V * D * itemsize

    # --- token-block size: ~1 MiB dense output tiles, multiple of 8 rows ----
    if tok_block is None:
        tok_block = (1 << 20) // max(D * itemsize, 1)
        tok_block = max(8, min(4096, tok_block))
    tok_block = min(int(tok_block), _round_up(T, 8))
    tok_block = max(8, _round_up(tok_block, 8))
    T_pad = _round_up(T, tok_block)

    flat_ids = jnp.clip(x_ids.reshape(-1).astype(jnp.int32), 0, V - 1)
    if T_pad != T:
        flat_ids = jnp.pad(flat_ids, (0, T_pad - T))  # pad with (valid) row 0

    # --- generation-aware VMEM budget ---------------------------------------
    vmem_cap = _vmem_capacity_bytes()
    out_bufs = 2 * tok_block * D * itemsize            # double-buffered output
    headroom = 4 << 20
    # Factor 2 on the table: the auto-pipelined resident table is still
    # double-buffered (see TODO above about single-buffering it).
    resident_need = 2 * table_bytes + out_bufs + headroom
    table_resident_ok = resident_need <= vmem_cap

    if path is None:
        if V <= 1024 and itemsize <= 2 and table_resident_ok:
            path = "onehot"          # exact for 16-bit tables
        elif table_resident_ok:
            path = "vmem"
        else:
            path = "hbm"

    grid = (T_pad // tok_block,)
    out_shape = jax.ShapeDtypeStruct((T_pad, D), embed_table.dtype)

    if path == "onehot":
        ids_2d = flat_ids.reshape(T_pad, 1)
        need = resident_need + 2 * tok_block * 4
        out_flat = pl.pallas_call(
            _embed_onehot_kernel,
            out_shape=out_shape,
            grid_spec=pltpu.PrefetchScalarGridSpec(
                num_scalar_prefetch=0,
                grid=grid,
                in_specs=[
                    pl.BlockSpec((tok_block, 1), lambda i: (i, 0)),
                    pl.BlockSpec((V, D), lambda i: (0, 0)),
                ],
                out_specs=pl.BlockSpec((tok_block, D), lambda i: (i, 0)),
            ),
            compiler_params=pltpu.CompilerParams(
                dimension_semantics=("parallel",),
                vmem_limit_bytes=int(min(vmem_cap, max(need, 32 << 20))),
            ),
        )(ids_2d, embed_table)

    elif path == "vmem":
        out_flat = pl.pallas_call(
            _embed_vmem_kernel,
            out_shape=out_shape,
            grid_spec=pltpu.PrefetchScalarGridSpec(
                num_scalar_prefetch=1,
                grid=grid,
                in_specs=[
                    # Whole table; constant block index -> DMA'd from HBM once.
                    pl.BlockSpec((V, D), lambda i, ids: (0, 0)),
                ],
                out_specs=pl.BlockSpec((tok_block, D), lambda i, ids: (i, 0)),
            ),
            compiler_params=pltpu.CompilerParams(
                dimension_semantics=("parallel",),
                vmem_limit_bytes=int(min(vmem_cap, max(resident_need, 32 << 20))),
            ),
        )(flat_ids, embed_table)

    else:  # "hbm"
        out_flat = pl.pallas_call(
            _embed_hbm_kernel,
            out_shape=out_shape,
            grid_spec=pltpu.PrefetchScalarGridSpec(
                num_scalar_prefetch=1,
                grid=grid,
                in_specs=[pl.BlockSpec(memory_space=pl.ANY)],
                out_specs=pl.BlockSpec((tok_block, D), lambda i, ids: (i, 0)),
                scratch_shapes=[pltpu.SemaphoreType.DMA((_NSEM,))],
            ),
            compiler_params=pltpu.CompilerParams(
                dimension_semantics=("parallel",),
            ),
        )(flat_ids, embed_table)

    return out_flat[:T].reshape(*lead_shape, D)


if __name__ == "__main__":
    vocab_size = 64
    d_model = 128
    B, S = 2, 8

    key = jax.random.PRNGKey(0)
    k_emb, k_ids = jax.random.split(key)

    # nn.Embedding default init: weight ~ N(0, 1)
    embed_table = jax.random.normal(k_emb, (vocab_size, d_model), dtype=jnp.float32)
    x_ids = jax.random.randint(k_ids, (B, S), 0, vocab_size, dtype=jnp.int32)
    ref = jnp.take(embed_table, x_ids, axis=0)

    # Auto path (f32 table, fits VMEM -> "vmem" resident-table row gather).
    out_auto = jax.block_until_ready(embedder_forward(x_ids, embed_table))
    assert out_auto.shape == (B, S, d_model)
    assert out_auto.dtype == jnp.float32
    assert jnp.array_equal(out_auto, ref), "auto (vmem) gather mismatch"

    # Multi-block grid on the VMEM path (exercises per-block offsets).
    out_v = jax.block_until_ready(
        embedder_forward(x_ids, embed_table, path="vmem", tok_block=8))
    assert jnp.array_equal(out_v, ref), "vmem gather mismatch"

    # Large-table fallback: per-row HBM DMA gather, forced here for coverage.
    out_h = jax.block_until_ready(
        embedder_forward(x_ids, embed_table, path="hbm", tok_block=8))
    assert jnp.array_equal(out_h, ref), "hbm row-DMA gather mismatch"

    # Tiny-vocab MXU path (bit-exact for 16-bit tables).
    table_bf16 = embed_table.astype(jnp.bfloat16)
    ref_bf16 = jnp.take(table_bf16, x_ids, axis=0)
    out_o = jax.block_until_ready(
        embedder_forward(x_ids, table_bf16, path="onehot"))
    assert out_o.dtype == jnp.bfloat16
    assert jnp.array_equal(out_o, ref_bf16), "one-hot MXU gather mismatch"

    # Ragged token count (pad-to-block + slice-off path).
    x_ids2 = jax.random.randint(k_ids, (3, 5), 0, vocab_size, dtype=jnp.int32)
    ref2 = jnp.take(embed_table, x_ids2, axis=0)
    out2 = jax.block_until_ready(
        embedder_forward(x_ids2, embed_table, path="vmem", tok_block=8))
    assert jnp.array_equal(out2, ref2), "padded-tail gather mismatch"

    print("KERNEL_OK")
</pallas_src>

<mosaic_0001>
module attributes {stable_mosaic.version = 11 : i64} {
  func.func @_embed_vmem_kernel(%arg0: i32, %arg1: memref<16xi32, #tpu.memory_space<smem>>, %arg2: memref<64x128xf32, #tpu.memory_space<vmem>>, %arg3: memref<16x128xf32, #tpu.memory_space<vmem>>) attributes {dimension_semantics = [#tpu.dimension_semantics<parallel>], iteration_bounds = array<i64: 1>, scalar_prefetch = 1 : i64, scratch_operands = 0 : i64, tpu.core_type = #tpu.core_type<tc>, window_params = [{pipeline_mode = #tpu.pipeline_mode<synchronous>, transform_indices = @transform_0, window_bounds = array<i64: 64, 128>}, {transform_indices = @transform_1, window_bounds = array<i64: 16, 128>}]} {
    %c16_i32 = arith.constant 16 : i32
    %0 = arith.muli %arg0, %c16_i32 : i32
    %c0_i32 = arith.constant 0 : i32
    %c8_i32 = arith.constant 8 : i32
    %1 = arith.muli %c0_i32, %c8_i32 : i32
    %2 = tpu.assume_multiple %1, 8 : i32
    %3 = arith.addi %0, %2 : i32
    %c0_i32_0 = arith.constant 0 : i32
    %4 = arith.addi %3, %c0_i32_0 : i32
    %5 = arith.index_cast %4 : i32 to index
    %6 = memref.load %arg1[%5] : memref<16xi32, #tpu.memory_space<smem>>
    %c1_i32 = arith.constant 1 : i32
    %7 = arith.addi %3, %c1_i32 : i32
    %8 = arith.index_cast %7 : i32 to index
    %9 = memref.load %arg1[%8] : memref<16xi32, #tpu.memory_space<smem>>
    %c2_i32 = arith.constant 2 : i32
    %10 = arith.addi %3, %c2_i32 : i32
    %11 = arith.index_cast %10 : i32 to index
    %12 = memref.load %arg1[%11] : memref<16xi32, #tpu.memory_space<smem>>
    %c3_i32 = arith.constant 3 : i32
    %13 = arith.addi %3, %c3_i32 : i32
    %14 = arith.index_cast %13 : i32 to index
    %15 = memref.load %arg1[%14] : memref<16xi32, #tpu.memory_space<smem>>
    %c4_i32 = arith.constant 4 : i32
    %16 = arith.addi %3, %c4_i32 : i32
    %17 = arith.index_cast %16 : i32 to index
    %18 = memref.load %arg1[%17] : memref<16xi32, #tpu.memory_space<smem>>
    %c5_i32 = arith.constant 5 : i32
    %19 = arith.addi %3, %c5_i32 : i32
    %20 = arith.index_cast %19 : i32 to index
    %21 = memref.load %arg1[%20] : memref<16xi32, #tpu.memory_space<smem>>
    %c6_i32 = arith.constant 6 : i32
    %22 = arith.addi %3, %c6_i32 : i32
    %23 = arith.index_cast %22 : i32 to index
    %24 = memref.load %arg1[%23] : memref<16xi32, #tpu.memory_space<smem>>
    %c7_i32 = arith.constant 7 : i32
    %25 = arith.addi %3, %c7_i32 : i32
    %26 = arith.index_cast %25 : i32 to index
    %27 = memref.load %arg1[%26] : memref<16xi32, #tpu.memory_space<smem>>
    %28 = arith.index_cast %6 : i32 to index
    %c0 = arith.constant 0 : index
    %29 = vector.load %arg2[%28, %c0] : memref<64x128xf32, #tpu.memory_space<vmem>>, vector<1x128xf32>
    %30 = arith.index_cast %9 : i32 to index
    %c0_1 = arith.constant 0 : index
    %31 = vector.load %arg2[%30, %c0_1] : memref<64x128xf32, #tpu.memory_space<vmem>>, vector<1x128xf32>
    %32 = arith.index_cast %12 : i32 to index
    %c0_2 = arith.constant 0 : index
    %33 = vector.load %arg2[%32, %c0_2] : memref<64x128xf32, #tpu.memory_space<vmem>>, vector<1x128xf32>
    %34 = arith.index_cast %15 : i32 to index
    %c0_3 = arith.constant 0 : index
    %35 = vector.load %arg2[%34, %c0_3] : memref<64x128xf32, #tpu.memory_space<vmem>>, vector<1x128xf32>
    %36 = arith.index_cast %18 : i32 to index
    %c0_4 = arith.constant 0 : index
    %37 = vector.load %arg2[%36, %c0_4] : memref<64x128xf32, #tpu.memory_space<vmem>>, vector<1x128xf32>
    %38 = arith.index_cast %21 : i32 to index
    %c0_5 = arith.constant 0 : index
    %39 = vector.load %arg2[%38, %c0_5] : memref<64x128xf32, #tpu.memory_space<vmem>>, vector<1x128xf32>
    %40 = arith.index_cast %24 : i32 to index
    %c0_6 = arith.constant 0 : index
    %41 = vector.load %arg2[%40, %c0_6] : memref<64x128xf32, #tpu.memory_space<vmem>>, vector<1x128xf32>
    %42 = arith.index_cast %27 : i32 to index
    %c0_7 = arith.constant 0 : index
    %43 = vector.load %arg2[%42, %c0_7] : memref<64x128xf32, #tpu.memory_space<vmem>>, vector<1x128xf32>
    %44 = tpu.concatenate %29, %31, %33, %35, %37, %39, %41, %43 in 0 : vector<1x128xf32>, vector<1x128xf32>, vector<1x128xf32>, vector<1x128xf32>, vector<1x128xf32>, vector<1x128xf32>, vector<1x128xf32>, vector<1x128xf32> -> vector<8x128xf32>
    %45 = arith.index_cast %2 : i32 to index
    %c0_8 = arith.constant 0 : index
    %46 = vector.load %arg3[%45, %c0_8] : memref<16x128xf32, #tpu.memory_space<vmem>>, vector<8x128xf32>
    tpu.vector_store %arg3[%45, %c0_8], %44 {strides = array<i32>} : memref<16x128xf32, #tpu.memory_space<vmem>>, vector<8x128xf32>,
    %c1_i32_9 = arith.constant 1 : i32
    %c8_i32_10 = arith.constant 8 : i32
    %47 = arith.muli %c1_i32_9, %c8_i32_10 : i32
    %48 = tpu.assume_multiple %47, 8 : i32
    %49 = arith.addi %0, %48 : i32
    %c0_i32_11 = arith.constant 0 : i32
    %50 = arith.addi %49, %c0_i32_11 : i32
    %51 = arith.index_cast %50 : i32 to index
    %52 = memref.load %arg1[%51] : memref<16xi32, #tpu.memory_space<smem>>
    %c1_i32_12 = arith.constant 1 : i32
    %53 = arith.addi %49, %c1_i32_12 : i32
    %54 = arith.index_cast %53 : i32 to index
    %55 = memref.load %arg1[%54] : memref<16xi32, #tpu.memory_space<smem>>
    %c2_i32_13 = arith.constant 2 : i32
    %56 = arith.addi %49, %c2_i32_13 : i32
    %57 = arith.index_cast %56 : i32 to index
    %58 = memref.load %arg1[%57] : memref<16xi32, #tpu.memory_space<smem>>
    %c3_i32_14 = arith.constant 3 : i32
    %59 = arith.addi %49, %c3_i32_14 : i32
    %60 = arith.index_cast %59 : i32 to index
    %61 = memref.load %arg1[%60] : memref<16xi32, #tpu.memory_space<smem>>
    %c4_i32_15 = arith.constant 4 : i32
    %62 = arith.addi %49, %c4_i32_15 : i32
    %63 = arith.index_cast %62 : i32 to index
    %64 = memref.load %arg1[%63] : memref<16xi32, #tpu.memory_space<smem>>
    %c5_i32_16 = arith.constant 5 : i32
    %65 = arith.addi %49, %c5_i32_16 : i32
    %66 = arith.index_cast %65 : i32 to index
    %67 = memref.load %arg1[%66] : memref<16xi32, #tpu.memory_space<smem>>
    %c6_i32_17 = arith.constant 6 : i32
    %68 = arith.addi %49, %c6_i32_17 : i32
    %69 = arith.index_cast %68 : i32 to index
    %70 = memref.load %arg1[%69] : memref<16xi32, #tpu.memory_space<smem>>
    %c7_i32_18 = arith.constant 7 : i32
    %71 = arith.addi %49, %c7_i32_18 : i32
    %72 = arith.index_cast %71 : i32 to index
    %73 = memref.load %arg1[%72] : memref<16xi32, #tpu.memory_space<smem>>
    %74 = arith.index_cast %52 : i32 to index
    %c0_19 = arith.constant 0 : index
    %75 = vector.load %arg2[%74, %c0_19] : memref<64x128xf32, #tpu.memory_space<vmem>>, vector<1x128xf32>
    %76 = arith.index_cast %55 : i32 to index
    %c0_20 = arith.constant 0 : index
    %77 = vector.load %arg2[%76, %c0_20] : memref<64x128xf32, #tpu.memory_space<vmem>>, vector<1x128xf32>
    %78 = arith.index_cast %58 : i32 to index
    %c0_21 = arith.constant 0 : index
    %79 = vector.load %arg2[%78, %c0_21] : memref<64x128xf32, #tpu.memory_space<vmem>>, vector<1x128xf32>
    %80 = arith.index_cast %61 : i32 to index
    %c0_22 = arith.constant 0 : index
    %81 = vector.load %arg2[%80, %c0_22] : memref<64x128xf32, #tpu.memory_space<vmem>>, vector<1x128xf32>
    %82 = arith.index_cast %64 : i32 to index
    %c0_23 = arith.constant 0 : index
    %83 = vector.load %arg2[%82, %c0_23] : memref<64x128xf32, #tpu.memory_space<vmem>>, vector<1x128xf32>
    %84 = arith.index_cast %67 : i32 to index
    %c0_24 = arith.constant 0 : index
    %85 = vector.load %arg2[%84, %c0_24] : memref<64x128xf32, #tpu.memory_space<vmem>>, vector<1x128xf32>
    %86 = arith.index_cast %70 : i32 to index
    %c0_25 = arith.constant 0 : index
    %87 = vector.load %arg2[%86, %c0_25] : memref<64x128xf32, #tpu.memory_space<vmem>>, vector<1x128xf32>
    %88 = arith.index_cast %73 : i32 to index
    %c0_26 = arith.constant 0 : index
    %89 = vector.load %arg2[%88, %c0_26] : memref<64x128xf32, #tpu.memory_space<vmem>>, vector<1x128xf32>
    %90 = tpu.concatenate %75, %77, %79, %81, %83, %85, %87, %89 in 0 : vector<1x128xf32>, vector<1x128xf32>, vector<1x128xf32>, vector<1x128xf32>, vector<1x128xf32>, vector<1x128xf32>, vector<1x128xf32>, vector<1x128xf32> -> vector<8x128xf32>
    %91 = arith.index_cast %48 : i32 to index
    %c0_27 = arith.constant 0 : index
    %92 = vector.load %arg3[%91, %c0_27] : memref<16x128xf32, #tpu.memory_space<vmem>>, vector<8x128xf32>
    tpu.vector_store %arg3[%91, %c0_27], %90 {strides = array<i32>} : memref<16x128xf32, #tpu.memory_space<vmem>>, vector<8x128xf32>,
    %c2_i32_28 = arith.constant 2 : i32
    return
  }
  func.func @transform_0(%arg0: i32, %arg1: memref<16xi32, #tpu.memory_space<smem>>) -> (i32, i32) {
    %c0_i32 = arith.constant 0 : i32
    %c0_i32_0 = arith.constant 0 : i32
    %c0_i32_1 = arith.constant 0 : i32
    return %c0_i32, %c0_i32_0 : i32, i32
  }
  func.func @transform_1(%arg0: i32, %arg1: memref<16xi32, #tpu.memory_space<smem>>) -> (i32, i32) {
    %c0_i32 = arith.constant 0 : i32
    %c0_i32_0 = arith.constant 0 : i32
    return %arg0, %c0_i32 : i32, i32
  }
}

</mosaic_0001>

<bundles_post_ra>
// kernel: tpu_custom_call.1
= control target key start
LH: loop header
LB: loop body
LE: loop exit
PB: predicated region body
PF: predicated region fallthrough
CT: control target
= control target key end

     0   :  { %s286_s12 = smov [#allocation3]   ;;  %s359_s0 = inlined_call_operand.hbm [shape: s32[16], index: 0, kind: input, shape index: {}]   ;;  %s360_s1 = inlined_call_operand.hbm [shape: f32[64,128], index: 1, kind: input, shape index: {}]   ;;  %s361_s2 = inlined_call_operand.hbm [shape: f32[16,128], index: 2, kind: output, shape index: {}]  }
   0x1   :  { %s8_s11 = sshll.u32 %s359_s0, 4  ;;  %s9_s11 = int_to_ptr.hbm [resolvable:$true] %s8_s11 }
   0x2   :  { %11 = dma.hbm_to_smem %s9_s11, 16, %s286_s12, [#allocation2] }
   0x3   :  { %280 = dma.done.wait [#allocation2], 16 }
   0x4   :  { %281 = vsyncadd [#allocation2], 4294967280 }
   0x5   :  { %14 = sfence }
   0x6   :  { %15 = vsyncpa [#allocation5], 0 }
   0x7   :  { %16 = vsyncpa [#allocation6], 0  ;;  %s21_s15 = sshll.u32 %s360_s1, 4  ;;  %s287_s16 = smov [#allocation4]   ;;  %s22_s15 = int_to_ptr.hbm [resolvable:$true] %s21_s15 }
   0x8   :  { %s23_s17 = sshll.u32 %s287_s16, 4  ;;  %s288_s18 = smov 128   ;;  %s24_s17 = int_to_ptr.vmem [resolvable:$true] %s23_s17 }
   0x9   :  { %s289_s19 = smov 8  }
   0xa   :  { %29 = dma.hbm_to_vmem [thread:$0]  %s22_s15, 1024, %s24_s17, [#allocation5], %s288_s18, %s288_s18, %s289_s19  }
   0xb   :  { %282 = dma.done.wait [#allocation5], 1024  }
   0xc   :  { %283 = vsyncadd [#allocation5], 4294966272  ;;  %s36_s0 = sld [smem:[#allocation3]]  ;;  %vm88_vm0 = vcmask 1040384   ;;  %vm90_vm1 = vcmask 1041408   ;;  %vm92_vm2 = vcmask 1042432  }
   0xd   :  { %s200_s20 = sld [smem:[#allocation3 + $0x1]]  ;;  %vm94_vm3 = vcmask 1043456   ;;  %vm96_vm4 = vcmask 1044480   ;;  %vm98_vm5 = vcmask 1045504   ;;  %vm100_vm6 = vcmask 1046528  }
   0xe   :  { %s201_s21 = sld [smem:[#allocation3 + $0x2]] }
   0xf   :  { %s202_s22 = sld [smem:[#allocation3 + $0x3]] }
  0x10   :  { %s203_s23 = sld [smem:[#allocation3 + $0x4]] }
  0x11   :  { %s315_s24 = sld [smem:[#allocation3 + $0x5]] }
  0x12   :  { %s317_s1 = sld [smem:[#allocation3 + $0x6]]  ;;  %s51_s26 = scalar_lea.vmem [#allocation4], %s36_s0 }
  0x13   :  { %s319_s25 = sld [smem:[#allocation3 + $0x7]]  ;;  %v52_v0 = vld [vmem:[%s51_s26] sm:$0x1]  ;;  %s53_s27 = scalar_lea.vmem [#allocation4], %s200_s20 }
  0x14   :  { %v54_v1 = vld [vmem:[%s53_s27] sm:$0x1]  ;;  %s321_s28 = sld [smem:[#allocation3 + $0x8]]  ;;  %s55_s29 = scalar_lea.vmem [#allocation4], %s201_s21 }
  0x15   :  { %v56_v2 = vld [vmem:[%s55_s29] sm:$0x1]  ;;  %v68_v3 = vrot.slane %v54_v1, 7  ;;  %s323_s30 = sld [smem:[#allocation3 + $0x9]]  ;;  %s57_s3 = scalar_lea.vmem [#allocation4], %s202_s22 }
  0x16   :  { %v58_v4 = vld [vmem:[%s57_s3] sm:$0x1]  ;;  %v71_v5 = vrot.slane %v56_v2, 6  ;;  %s325_s4 = sld [smem:[#allocation3 + $0xa]]  ;;  %s59_s5 = scalar_lea.vmem [#allocation4], %s203_s23 }
  0x17   :  { %v60_v6 = vld [vmem:[%s59_s5] sm:$0x1]  ;;  %v74_v7 = vrot.slane %v58_v4, 5  ;;  %v89_v8 = vsel %vm88_vm0, %v52_v0, %v68_v3  ;;  %s328_s6 = sld [smem:[#allocation3 + $0xb]]  ;;  %s61_s7 = scalar_lea.vmem [#allocation4], %s315_s24 }
  0x18   :  { %v62_v9 = vld [vmem:[%s61_s7] sm:$0x1]  ;;  %v77_v10 = vrot.slane %v60_v6, 4  ;;  %v91_v11 = vsel %vm90_vm1, %v89_v8, %v71_v5  ;;  %s211_s8 = sld [smem:[#allocation3 + $0xc]]  ;;  %s63_s9 = scalar_lea.vmem [#allocation4], %s317_s1 }
  0x19   :  { %v64_v12 = vld [vmem:[%s63_s9] sm:$0x1]  ;;  %v80_v13 = vrot.slane %v62_v9, 3  ;;  %v93_v14 = vsel %vm92_vm2, %v91_v11, %v74_v7  ;;  %s212_s10 = sld [smem:[#allocation3 + $0xd]]  ;;  %s65_s11 = scalar_lea.vmem [#allocation4], %s319_s25 }
  0x1a   :  { %v66_v15 = vld [vmem:[%s65_s11] sm:$0x1]  ;;  %v83_v16 = vrot.slane %v64_v12, 2  ;;  %v95_v17 = vsel %vm94_vm3, %v93_v14, %v77_v10  ;;  %s213_s12 = sld [smem:[#allocation3 + $0xe]]  ;;  %s119_s14 = scalar_lea.vmem [#allocation4], %s321_s28 }
  0x1b   :  { %v86_v18 = vrot.slane %v66_v15, 1  ;;  %v97_v19 = vsel %vm96_vm4, %v95_v17, %v80_v13  ;;  %s337_s13 = sld [smem:[#allocation3 + $0xf]]  ;;  %v120_v21 = vld [vmem:[%s119_s14] sm:$0x1]  ;;  %s121_s15 = scalar_lea.vmem [#allocation4], %s323_s30 }
  0x1c   :  { %v99_v20 = vsel %vm98_vm5, %v97_v19, %v83_v16  ;;  %v122_v22 = vld [vmem:[%s121_s15] sm:$0x1]  ;;  %s123_s16 = scalar_lea.vmem [#allocation4], %s325_s4  ;;  %s290_s21 = smov [#allocation7]  }
  0x1d   :  { %v101_v23 = vsel %vm100_vm6, %v99_v20, %v86_v18  ;;  %v124_v24 = vld [vmem:[%s123_s16] sm:$0x1]  ;;  %v136_v25 = vrot.slane %v122_v22, 7  ;;  %s125_s17 = scalar_lea.vmem [#allocation4], %s328_s6  ;;  %s169_s22 = sshll.u32 %s290_s21, 4  ;;  %s170_s22 = int_to_ptr.vmem [resolvable:$true] %s169_s22 }
  0x1e   :  { %102 = vst [vmem:[#allocation7] sm:$0xff] %v101_v23  ;;  %v126_v26 = vld [vmem:[%s125_s17] sm:$0x1]  ;;  %v139_v27 = vrot.slane %v124_v24, 6  ;;  %s127_s0 = scalar_lea.vmem [#allocation4], %s211_s8  ;;  %s171_s25 = sshll.u32 %s361_s2, 4  ;;  %s172_s25 = int_to_ptr.hbm [resolvable:$true] %s171_s25 }
  0x1f   :  { %v128_v28 = vld [vmem:[%s127_s0] sm:$0x1]  ;;  %v142_v29 = vrot.slane %v126_v26, 5  ;;  %v156_v30 = vsel %vm88_vm0, %v120_v21, %v136_v25  ;;  %s129_s20 = scalar_lea.vmem [#allocation4], %s212_s10 }
  0x20   :  { %v130_v31 = vld [vmem:[%s129_s20] sm:$0x1]  ;;  %v145_v32 = vrot.slane %v128_v28, 4  ;;  %v157_v33 = vsel %vm90_vm1, %v156_v30, %v139_v27  ;;  %s131_s23 = scalar_lea.vmem [#allocation4], %s213_s12 }
  0x21   :  { %v132_v34 = vld [vmem:[%s131_s23] sm:$0x1]  ;;  %v148_v35 = vrot.slane %v130_v31, 3  ;;  %v158_v36 = vsel %vm92_vm2, %v157_v33, %v142_v29  ;;  %s133_s26 = scalar_lea.vmem [#allocation4], %s337_s13 }
  0x22   :  { %v134_v37 = vld [vmem:[%s133_s26] sm:$0x1]  ;;  %v151_v38 = vrot.slane %v132_v34, 2  ;;  %v159_v39 = vsel %vm94_vm3, %v158_v36, %v145_v32 }
  0x23   :  { %v154_v40 = vrot.slane %v134_v37, 1  ;;  %v160_v41 = vsel %vm96_vm4, %v159_v39, %v148_v35 }
  0x24   :  { %v161_v42 = vsel %vm98_vm5, %v160_v41, %v151_v38 }
  0x25   :  { %v162_v43 = vsel %vm100_vm6, %v161_v42, %v154_v40 }
  0x26   :  { %164 = vst [vmem:[#allocation7 + $0x8] sm:$0xff] %v162_v43 }
  0x27   :  { %177 = dma.vmem_to_hbm [thread:$0]  %s170_s22, 256, %s172_s25, [#allocation6], %s288_s18, %s288_s18, %s289_s19  }
  0x28   :  { %284 = dma.done.wait [#allocation6], 256  }
  0x29   :  { %285 = vsyncadd [#allocation6], 4294967040 }
  0x2a   :  { %182 = vsyncpa [#allocation5], 1 }
  0x2b   :  { %183 = vsyncpa [#allocation6], 1 }

</bundles_post_ra>
